<compile_context>
chip_gen: v5e
topology: v5e:2x2
jax: 0.10.0
libtpu: 0.0.40
codegen_flags: <defaults>
</compile_context>

<pallas_src>
import math

import jax
import jax.numpy as jnp
from jax.experimental import pallas as pl
from jax.experimental.pallas import tpu as pltpu


# ----------------------------- config (synthetic, deterministic) -----------------------------
ENCODING_DEFORM3D_CFG = dict(
    otype="HashGrid",
    n_levels=4,
    n_features_per_level=2,
    log2_hashmap_size=8,      # T = 256 entries / level
    base_resolution=4,
    per_level_scale=1.5,
)
NETWORK_DEFORM_CFG = dict(
    otype="FullyFusedMLP",
    activation="ReLU",
    output_activation="None",
    n_neurons=32,
    n_hidden_layers=2,
)
N_INPUT_DIMS = 3
N_OUTPUT_DIMS = 2


# ----------------------------- 3-D hash-grid encoding glue (plain JAX) -----------------------
def hashgrid_encode_3d(x, table, base_resolution, per_level_scale):
    """tcnn-style multiresolution 3-D hash encoding with trilinear interpolation.

    x:     [N, 3] float32 in [0, 1]
    table: [L, T, F] float32 hash table
    Returns enc: [N, L*F] float32 (level-major, feature-minor)
    """
    L, T, F = table.shape
    primes = jnp.array([1, 2654435761, 805459861], dtype=jnp.uint32)
    corners = jnp.array(
        [[0, 0, 0], [1, 0, 0], [0, 1, 0], [1, 1, 0],
         [0, 0, 1], [1, 0, 1], [0, 1, 1], [1, 1, 1]], dtype=jnp.uint32)      # [8, 3]

    enc_levels = []
    for l in range(L):
        scale = base_resolution * (per_level_scale ** l) - 1.0
        res = int(math.ceil(scale)) + 1

        pos = x.astype(jnp.float32) * scale + 0.5
        pos_floor = jnp.floor(pos)
        frac = pos - pos_floor                                   # [N, 3]
        idx0 = pos_floor.astype(jnp.uint32)                      # [N, 3]
        cidx = idx0[:, None, :] + corners[None, :, :]            # [N, 8, 3]

        if res * res * res <= T:
            # dense indexing; clamp so the domain-edge corner stays inside the table
            cidx = jnp.minimum(cidx, jnp.uint32(res - 1))
            h = (cidx[..., 0]
                 + cidx[..., 1] * jnp.uint32(res)
                 + cidx[..., 2] * jnp.uint32(res * res))
        else:
            # spatial hash (tcnn primes); table size is a power of two
            h = ((cidx[..., 0] * primes[0])
                 ^ (cidx[..., 1] * primes[1])
                 ^ (cidx[..., 2] * primes[2]))
            h = h & jnp.uint32(T - 1)
        h = h.astype(jnp.int32)                                  # [N, 8]

        corner_feats = table[l][h]                               # [N, 8, F]

        # trilinear weights: prod over dims of (1-frac) or frac depending on corner bit
        w = jnp.where(corners[None, :, :] == 0,
                      1.0 - frac[:, None, :], frac[:, None, :])  # [N, 8, 3]
        w = jnp.prod(w, axis=-1)                                 # [N, 8]

        enc_levels.append(jnp.sum(corner_feats * w[..., None], axis=1))   # [N, F]

    return jnp.concatenate(enc_levels, axis=-1)                  # [N, L*F]


# ----------------------------- Pallas kernel (MLP decoder, hot path) -------------------------
def _decoder_kernel(inp_ref, w1t_ref, w2t_ref, w3t_ref, o_ref):
    """Weights-stationary (transposed) FullyFusedMLP.

    inp_ref: [D_in, tile_n] bf16   (batch in lanes -> lane-dense)
    w1t_ref: [H, D_in]     bf16
    w2t_ref: [H, H]        bf16
    w3t_ref: [2, H]        bf16
    o_ref:   [2, tile_n]   f32
    """
    h = jnp.dot(w1t_ref[...], inp_ref[...], preferred_element_type=jnp.float32)   # [H, tn]
    h = jnp.maximum(h, 0.0).astype(jnp.bfloat16)                                  # ReLU hidden 1
    h = jnp.dot(w2t_ref[...], h, preferred_element_type=jnp.float32)              # [H, tn]
    h = jnp.maximum(h, 0.0).astype(jnp.bfloat16)                                  # ReLU hidden 2
    o = jnp.dot(w3t_ref[...], h, preferred_element_type=jnp.float32)              # [2, tn]
    o_ref[...] = o / 5.0                                                          # decoder(...)/5


def deform_hash3d_warp_forward(xyt_norm, params, *, step=0, aneal_func=None, tile_n=512):
    """Forward pass of Deform_Hash3d_Warp.  xyt_norm: [N, 3] float32 in [0, 1] -> [N, 2]."""
    table = params["table"]

    # --- encoding + concat in JAX glue (fused by XLA into the gather consumer) ---
    enc = hashgrid_encode_3d(xyt_norm, table,
                             ENCODING_DEFORM3D_CFG["base_resolution"],
                             ENCODING_DEFORM3D_CFG["per_level_scale"])            # [N, E]
    if aneal_func is not None:
        enc = aneal_func(enc, step)
    inp = jnp.concatenate([xyt_norm.astype(jnp.float32), enc], axis=-1)           # [N, 3+E]
    # `weight = torch.ones(input.shape[-1]) * input` is a no-op -> removed.

    N, d_in = inp.shape
    H = params["w2"].shape[0]
    assert params["w1"].shape == (d_in, H)

    # pad batch to a multiple of tile_n (zeros -> MLP(0) = 0, sliced off at the end)
    n_pad = ((N + tile_n - 1) // tile_n) * tile_n
    if n_pad != N:
        inp = jnp.pad(inp, ((0, n_pad - N), (0, 0)))

    # bf16 operands (halves HBM bytes, matches tcnn fp16 internals), batch in the lane dim
    inp_t = inp.astype(jnp.bfloat16).T                    # [d_in, n_pad]
    w1t = params["w1"].astype(jnp.bfloat16).T             # [H, d_in]
    w2t = params["w2"].astype(jnp.bfloat16).T             # [H, H]
    w3t = params["w3"].astype(jnp.bfloat16).T             # [2, H]

    grid = (n_pad // tile_n,)
    # NOTE: could add pipeline_mode=pl.Buffered(3) to the streaming input spec on v6e if the
    # DMA is still exposed after these changes; left at the default double buffer here.
    out_t = pl.pallas_call(
        _decoder_kernel,
        out_shape=jax.ShapeDtypeStruct((N_OUTPUT_DIMS, n_pad), jnp.float32),
        grid_spec=pltpu.PrefetchScalarGridSpec(
            num_scalar_prefetch=0,
            grid=grid,
            in_specs=[
                pl.BlockSpec((d_in, tile_n), lambda i: (0, i)),        # streamed input slab
                pl.BlockSpec((H, d_in), lambda i: (0, 0)),             # W1^T (grid-invariant)
                pl.BlockSpec((H, H), lambda i: (0, 0)),                # W2^T (grid-invariant)
                pl.BlockSpec((N_OUTPUT_DIMS, H), lambda i: (0, 0)),    # W3^T (grid-invariant)
            ],
            out_specs=pl.BlockSpec((N_OUTPUT_DIMS, tile_n), lambda i: (0, i)),  # lane-dense
        ),
        compiler_params=pltpu.CompilerParams(dimension_semantics=("parallel",)),
    )(inp_t, w1t, w2t, w3t)                               # [2, n_pad] f32

    return out_t[:, :N].T                                 # [N, 2]


# ----------------------------- pure-JAX reference (mirrors bf16 handling) --------------------
def reference_forward(xyt_norm, params, *, step=0, aneal_func=None):
    enc = hashgrid_encode_3d(xyt_norm, params["table"],
                             ENCODING_DEFORM3D_CFG["base_resolution"],
                             ENCODING_DEFORM3D_CFG["per_level_scale"])
    if aneal_func is not None:
        enc = aneal_func(enc, step)
    inp = jnp.concatenate([xyt_norm, enc], axis=-1)
    inp = inp * jnp.ones((inp.shape[-1],), jnp.float32)   # weight = ones (no-op, kept for fidelity)
    inp = inp.astype(jnp.bfloat16)
    w1 = params["w1"].astype(jnp.bfloat16)
    w2 = params["w2"].astype(jnp.bfloat16)
    w3 = params["w3"].astype(jnp.bfloat16)
    h = jnp.maximum(jnp.dot(inp, w1, preferred_element_type=jnp.float32), 0.0).astype(jnp.bfloat16)
    h = jnp.maximum(jnp.dot(h, w2, preferred_element_type=jnp.float32), 0.0).astype(jnp.bfloat16)
    out = jnp.dot(h, w3, preferred_element_type=jnp.float32)
    return out / 5.0


# ----------------------------- deterministic parameter init ----------------------------------
def init_params(key):
    L = ENCODING_DEFORM3D_CFG["n_levels"]
    F = ENCODING_DEFORM3D_CFG["n_features_per_level"]
    T = 2 ** ENCODING_DEFORM3D_CFG["log2_hashmap_size"]
    E = L * F
    H = NETWORK_DEFORM_CFG["n_neurons"]
    d_in = N_INPUT_DIMS + E                              # decoder n_input_dims = E + 3

    k_tab, k1, k2, k3 = jax.random.split(key, 4)
    table = jax.random.uniform(k_tab, (L, T, F), jnp.float32, -1e-4, 1e-4)  # tcnn default init
    w1 = jax.random.normal(k1, (d_in, H), jnp.float32) * (1.0 / math.sqrt(d_in))
    w2 = jax.random.normal(k2, (H, H), jnp.float32) * (1.0 / math.sqrt(H))
    w3 = jax.random.normal(k3, (H, N_OUTPUT_DIMS), jnp.float32) * (1.0 / math.sqrt(H))
    return dict(table=table, w1=w1, w2=w2, w3=w3)


# ----------------------------- main -----------------------------------------------------------
if __name__ == "__main__":
    key = jax.random.PRNGKey(0)
    k_params, k_x = jax.random.split(key)
    params = init_params(k_params)

    N = 1000                                             # exercises padding: pads to 1024 = 2 tiles
    xyt = jax.random.uniform(k_x, (N, N_INPUT_DIMS), jnp.float32)   # (x, y, t) in [0, 1)

    out = jax.block_until_ready(deform_hash3d_warp_forward(xyt, params, tile_n=512))
    ref = jax.block_until_ready(reference_forward(xyt, params))

    assert out.shape == (N, N_OUTPUT_DIMS)
    max_err = float(jnp.max(jnp.abs(out - ref)))
    assert jnp.allclose(out, ref, atol=1e-3, rtol=1e-2), (
        f"Pallas kernel mismatch vs reference, max abs err = {max_err}")
    print("KERNEL_OK")
</pallas_src>

<mosaic_0001>
module attributes {stable_mosaic.version = 11 : i64} {
  func.func @_decoder_kernel(%arg0: i32, %arg1: memref<11x512xbf16, #tpu.memory_space<vmem>>, %arg2: memref<32x11xbf16, #tpu.memory_space<vmem>>, %arg3: memref<32x32xbf16, #tpu.memory_space<vmem>>, %arg4: memref<2x32xbf16, #tpu.memory_space<vmem>>, %arg5: memref<2x512xf32, #tpu.memory_space<vmem>>) attributes {dimension_semantics = [#tpu.dimension_semantics<parallel>], iteration_bounds = array<i64: 2>, scalar_prefetch = 0 : i64, scratch_operands = 0 : i64, tpu.core_type = #tpu.core_type<tc>, window_params = [{transform_indices = @transform_0, window_bounds = array<i64: 11, 512>}, {pipeline_mode = #tpu.pipeline_mode<synchronous>, transform_indices = @transform_1, window_bounds = array<i64: 32, 11>}, {pipeline_mode = #tpu.pipeline_mode<synchronous>, transform_indices = @transform_2, window_bounds = array<i64: 32, 32>}, {pipeline_mode = #tpu.pipeline_mode<synchronous>, transform_indices = @transform_3, window_bounds = array<i64: 2, 32>}, {transform_indices = @transform_4, window_bounds = array<i64: 2, 512>}]} {
    %c0 = arith.constant 0 : index
    %c0_0 = arith.constant 0 : index
    %0 = vector.load %arg2[%c0, %c0_0] : memref<32x11xbf16, #tpu.memory_space<vmem>>, vector<32x11xbf16>
    %c0_1 = arith.constant 0 : index
    %c0_2 = arith.constant 0 : index
    %1 = vector.load %arg1[%c0_1, %c0_2] : memref<11x512xbf16, #tpu.memory_space<vmem>>, vector<11x512xbf16>
    %cst = arith.constant dense<0.000000e+00> : vector<32x512xf32>
    %2 = tpu.matmul %0, %1, %cst {dimension_numbers = #tpu.dot_dimension_numbers<[1], [0], [0], [1], [0, 0, 1, 1], [], []>} : vector<32x11xbf16>, vector<11x512xbf16>, vector<32x512xf32> -> vector<32x512xf32>
    %cst_3 = arith.constant 0.000000e+00 : f32
    %3 = vector.broadcast %cst_3 : f32 to vector<32x512xf32>
    %4 = arith.maximumf %2, %3 : vector<32x512xf32>
    %5 = arith.truncf %4 : vector<32x512xf32> to vector<32x512xbf16>
    %c0_4 = arith.constant 0 : index
    %c0_5 = arith.constant 0 : index
    %6 = vector.load %arg3[%c0_4, %c0_5] : memref<32x32xbf16, #tpu.memory_space<vmem>>, vector<32x32xbf16>
    %cst_6 = arith.constant dense<0.000000e+00> : vector<32x512xf32>
    %7 = tpu.matmul %6, %5, %cst_6 {dimension_numbers = #tpu.dot_dimension_numbers<[1], [0], [0], [1], [0, 0, 1, 1], [], []>} : vector<32x32xbf16>, vector<32x512xbf16>, vector<32x512xf32> -> vector<32x512xf32>
    %cst_7 = arith.constant 0.000000e+00 : f32
    %8 = vector.broadcast %cst_7 : f32 to vector<32x512xf32>
    %9 = arith.maximumf %7, %8 : vector<32x512xf32>
    %10 = arith.truncf %9 : vector<32x512xf32> to vector<32x512xbf16>
    %c0_8 = arith.constant 0 : index
    %c0_9 = arith.constant 0 : index
    %11 = vector.load %arg4[%c0_8, %c0_9] : memref<2x32xbf16, #tpu.memory_space<vmem>>, vector<2x32xbf16>
    %cst_10 = arith.constant dense<0.000000e+00> : vector<2x512xf32>
    %12 = tpu.matmul %11, %10, %cst_10 {dimension_numbers = #tpu.dot_dimension_numbers<[1], [0], [0], [1], [0, 0, 1, 1], [], []>} : vector<2x32xbf16>, vector<32x512xbf16>, vector<2x512xf32> -> vector<2x512xf32>
    %cst_11 = arith.constant 5.000000e+00 : f32
    %13 = vector.broadcast %cst_11 : f32 to vector<2x512xf32>
    %14 = arith.divf %12, %13 : vector<2x512xf32>
    %c0_12 = arith.constant 0 : index
    %c0_13 = arith.constant 0 : index
    %15 = vector.load %arg5[%c0_12, %c0_13] : memref<2x512xf32, #tpu.memory_space<vmem>>, vector<2x512xf32>
    tpu.vector_store %arg5[%c0_12, %c0_13], %14 {strides = array<i32>} : memref<2x512xf32, #tpu.memory_space<vmem>>, vector<2x512xf32>,
    return
  }
  func.func @transform_0(%arg0: i32) -> (i32, i32) {
    %c0_i32 = arith.constant 0 : i32
    %c0_i32_0 = arith.constant 0 : i32
    return %c0_i32, %arg0 : i32, i32
  }
  func.func @transform_1(%arg0: i32) -> (i32, i32) {
    %c0_i32 = arith.constant 0 : i32
    %c0_i32_0 = arith.constant 0 : i32
    %c0_i32_1 = arith.constant 0 : i32
    return %c0_i32, %c0_i32_0 : i32, i32
  }
  func.func @transform_2(%arg0: i32) -> (i32, i32) {
    %c0_i32 = arith.constant 0 : i32
    %c0_i32_0 = arith.constant 0 : i32
    %c0_i32_1 = arith.constant 0 : i32
    return %c0_i32, %c0_i32_0 : i32, i32
  }
  func.func @transform_3(%arg0: i32) -> (i32, i32) {
    %c0_i32 = arith.constant 0 : i32
    %c0_i32_0 = arith.constant 0 : i32
    %c0_i32_1 = arith.constant 0 : i32
    return %c0_i32, %c0_i32_0 : i32, i32
  }
  func.func @transform_4(%arg0: i32) -> (i32, i32) {
    %c0_i32 = arith.constant 0 : i32
    %c0_i32_0 = arith.constant 0 : i32
    return %c0_i32, %arg0 : i32, i32
  }
}

</mosaic_0001>

<bundles_post_ra>
// kernel: tpu_custom_call.1
= control target key start
LH: loop header
LB: loop body
LE: loop exit
PB: predicated region body
PF: predicated region fallthrough
CT: control target
= control target key end

     0   :  { %9 = vsyncpa [#allocation3], 0  ;;  %s1078_s0 = inlined_call_operand.hbm [shape: bf16[11,1024], index: 0, kind: input, shape index: {}]   ;;  %s1079_s1 = inlined_call_operand.vmem [shape: bf16[32,11], index: 1, kind: input, shape index: {}]   ;;  %s1080_s2 = inlined_call_operand.vmem [shape: bf16[32,32], index: 2, kind: input, shape index: {}]   ;;  %s1081_s3 = inlined_call_operand.vmem [shape: bf16[2,32], index: 3, kind: input, shape index: {}]   ;;  %s1082_s4 = inlined_call_operand.hbm [shape: f32[2,1024], index: 4, kind: output, shape index: {}]  }
   0x1   :  { %11 = vsyncpa [#allocation3 + $0x1], 0 }
   0x2   :  { %12 = vsyncpa [#allocation4], 0 }
   0x3   :  { %14 = vsyncpa [#allocation4 + $0x1], 0  ;;  %s925_s15 = smov 0   ;;  %s927_s16 = smov 0  }
   0x4   :  { %s929_s17 = smov 0   ;;  %s931_s18 = smov 0  }
   0x5 LB: > { %s946_s19 = sadd.s32 4294967295, %s893_s18   ;;  %s668_s20 = sadd.s32 4294967294, %s893_s18   ;;  %s893_s18 = sphi %s931_s18, %s1091_s18   ;;  %s889_s17 = sphi %s929_s17, %s1090_s17   ;;  %s885_s16 = sphi %s927_s16, %s1089_s16   ;;  %s881_s15 = sphi %s925_s15, %s1088_s15  }
   0x6   : > { %s950_s21 = sadd.s32 1, %s893_s18   ;;  %s27_s22 = sadd.s32 1, %s889_s17 }
   0x7   : > { %s24_s23 = ssub.s32 %s893_s18, %s950_s21  ;;  %p34_p0 = scmp.ne.s32.totalorder %s889_s17, %s885_s16 }
   0x8   : > { %p25_p1 = scmp.eq.s32.totalorder %s24_s23, 0  ;;  %p35_p2 = scmp.eq.s32.totalorder %s893_s18, 0 }
   0x9   : > { %p40_p3 = scmp.ne.s32.totalorder %s885_s16, %s881_s15  ;;  %p41_p4 = scmp.eq.s32.totalorder %s946_s19, 0 }
   0xa   : > { %s962_s24 = scalar_select %p25_p1, %s889_s17, %s27_s22  }
   0xb   : > { %p964_p5 = por %p35_p2, %p34_p0  ;;  %p968_p6 = por %p41_p4, %p40_p3 }
   0xc   : > { %p127_p7 = scmp.eq.s32.totalorder %s946_s19, 1  ;;  %p133_p8 = scmp.eq.s32.totalorder %s668_s20, 1 }
   0xd   : > { %p670_p9 = scmp.ge.s32.totalorder %s893_s18, 2  ;;  %p756_p10 = scmp.lt.s32.totalorder %s893_s18, 2 }
   0xe   : > { %p975_p11 = por %p127_p7, %p34_p0  ;;  %p979_p12 = por %p133_p8, %p40_p3 }
   0xf   : > { %s162_s29 = sand.u32 1, %s889_s17   ;;  %s734_s30 = sshll.u32 %s893_s18, 4 }
  0x10   : > { %s671_s5 = sshll.u32 %s162_s29, 5  ;;  %s171_s8 = scalar_lea.hbm %s1078_s0, %s734_s30 }
  0x11   : > { %s172_s9 = sshll.u32 %s171_s8, 4  ;;  %s166_s10 = scalar_lea.vmem [#allocation2], %s671_s5  ;;  %s173_s9 = int_to_ptr.hbm [resolvable:$true] %s172_s9 }
  0x12   : > { %s174_s11 = sshll.u32 %s166_s10, 4  ;;  %p990_p13 = pnand %p756_p10, %p964_p5  ;;  %s175_s11 = int_to_ptr.vmem [resolvable:$true] %s174_s11 }
  0x13   : > { %p674_p0 = scmp.ge.s32.totalorder %s893_s18, 1  ;;  %s163_s13 = scalar_lea.sflag [#allocation3], %s162_s29 }
  0x14   : > { %s797_s14 = sshra.s32 %s173_s9, 4  ;;  %p801_p2 = pneg %p990_p13  ;;  %s798_s14 = int_to_ptr.hbm [resolvable:$true] %s797_s14 }
  0x15   : > { %s799_s20 = scalar_lea.hbm %s798_s14, 32  ;;  %s804_s30 = scalar_lea.hbm %s1078_s0, 64 }
  0x16   : > { %p800_p1 = scmp.ne.s32.totalorder %s798_s14, %s799_s20  ;;  %p805_p5 = scmp.lt.s32.totalorder %s798_s14, %s1078_s0 }
  0x17   : > { %p806_p7 = scmp.lt.s32.totalorder %s804_s30, %s799_s20 }
  0x18   : > { %p802_p3 = pnand %p801_p2, %p800_p1 }
  0x19   : > { %p807_p8 = por %p806_p7, %p805_p5 }
  0x1a   : > { %p803_p4 = pneg %p802_p3 }
  0x1c   : > { %p808_p10 = pnand %p807_p8, %p803_p4 }
  0x1e   : > { %811 = shalt.err (!%p808_p10)
}
  0x1f   : > { %s895_s29 = smov 512   ;;  %s896_s6 = smov 256  }
  0x20   : > { %s897_s7 = smov 16   ;;  %p182_p1 = scmp.lt.s32.totalorder %s893_s18, 3 }
  0x21   : > { %751 = dma.hbm_to_vmem [thread:$0]  (!%p990_p13), %s173_s9, 512, %s175_s11, %s163_s13, %s895_s29, %s896_s6, %s897_s7  }
  0x22   : > { %p183_p2 = pnand %p674_p0, %p182_p1 }
  0x23   : > { %s1009_s8 = sand.u32 (!%p183_p2), 1, %s885_s16  }
  0x24   : > { %186 = sbr.rel (%p183_p2) target bundleno = 530 (0x212), region = 36  ;;  %s675_s10 = sshll.u32 (!%p183_p2), %s1009_s8, 5 }
  0x25   : > { %s189_s14 = scalar_lea.sflag (!%p183_p2), [#allocation3], %s1009_s8  ;;  %s192_s20 = scalar_lea.vmem (!%p183_p2), [#allocation2], %s675_s10 }
  0x29   : > { %872 = dma.done.wait (%p968_p6), %s189_s14, 512  }
  0x2a   : > { %874 = vsyncadd (%p968_p6), %s189_s14, 4294966784  ;;  %vm262_vm0 = vcmask 1044480   ;;  %vm263_vm1 = vcmask 1045504   ;;  %v898_v0 = vmov 65535   ;;  %v687_v3 = vld [vmem:[%s192_s20] sm:$0xf] }
  0x2b   : > { %v264_v1 = vsel %vm262_vm0, 4294967295, %v898_v0  ;;  %v739_v4 = vld [vmem:[%s192_s20 + $0xc] sm:$0x30]  ;;  %v737_v5 = vld [vmem:[%s192_s20 + $0x4] sm:$0xf]  ;;  %vm255_vm2 = vcmask 89088  }
  0x2c   : > { %v265_v2 = vsel %vm263_vm1, %v264_v1, 0  ;;  %v688_v6 = vor.u32 %v739_v4, %v687_v3  ;;  %v689_v7 = vld [vmem:[%s192_s20 + $0x10] sm:$0x30]  ;;  %v695_v8 = vld [vmem:[%s192_s20 + $0x8] sm:$0xf]  ;;  %v735_v18 = vld [vmem:[%s1079_s1] sm:$0xff] }
  0x2d   : > { %v740_v9 = vld [vmem:[%s192_s20 + $0x14] sm:$0x30]  ;;  %v692_v10 = vor.u32 %v737_v5, %v689_v7  ;;  %v738_v12 = vld [vmem:[%s192_s20 + $0xc] sm:$0xf]  ;;  %v697_v13 = vld [vmem:[%s192_s20 + $0x18] sm:$0x30] }
  0x2e   : > { %v696_v11 = vor.u32 %v740_v9, %v695_v8  ;;  %v267_v14 = vand.u32 %v688_v6, %v265_v2  ;;  %v700_v15 = vor.u32 %v738_v12, %v697_v13  ;;  %v736_v20 = vld [vmem:[%s1079_s1 + $0x8] sm:$0xff]  ;;  %v741_v51 = vld [vmem:[%s1080_s2] sm:$0xff]  ;;  %vm392_vm3 = vcmask 261120   ;;  %s676_s29 = sshll.u32 %s1009_s8, 3  ;;  %s743_s6 = sshll.u32 %s946_s19, 3 }
  0x2f   : > { %v270_v16 = vand.u32 %v692_v10, %v265_v2  ;;  %v742_v62 = vld [vmem:[%s1080_s2 + $0x8] sm:$0xff]  ;;  %s593_s14 = scalar_lea.hbm %s1082_s4, %s743_s6  ;;  %vm573_vm5 = vcmask 1041408   ;;  %vm575_vm6 = vcmask 1045508   ;;  %s217_s20 = scalar_lea.vmem [#allocation5], %s676_s29  ;;  %vm577_vm7 = vcmask 1043456  }
  0x30   : > { %v273_v17 = vand.u32 %v696_v11, %v265_v2  ;;  %285 = vmatpush.bf16.msra.mxu0 %v267_v14  ;;  %v276_v19 = vand.u32 %v700_v15, %v265_v2  ;;  %s595_s26 = sshll.u32 %s217_s20, 4  ;;  %s597_s9 = sshll.u32 %s593_s14, 4  ;;  %s596_s26 = int_to_ptr.vmem [resolvable:$true] %s595_s26  ;;  %s598_s9 = int_to_ptr.hbm [resolvable:$true] %s597_s9 }
  0x31   : > { %304 = vmatpush.bf16.msra.mxu1 %v270_v16  ;;  %s582_s19 = scalar_lea.sflag [#allocation4], %s1009_s8  ;;  %s841_s11 = sshra.s32 %s598_s9, 4  ;;  %s842_s11 = int_to_ptr.hbm [resolvable:$true] %s841_s11 }
  0x32   : > { %323 = vmatpush.bf16.msra.mxu2 %v273_v17  ;;  %342 = vmatpush.bf16.msra.mxu3 %v276_v19  ;;  %s843_s12 = scalar_lea.hbm %s842_s11, 8  ;;  %s847_s23 = scalar_lea.hbm %s1082_s4, 16 }
  0x33   : > { %701 = vmatmul.msk.bf16.vlgmr.msra.gmra.mxu0 %vm255_vm2, %v735_v18  ;;  %p844_p6 = scmp.ne.s32.totalorder %s842_s11, %s843_s12  ;;  %p848_p3 = scmp.lt.s32.totalorder %s842_s11, %s1082_s4 }
  0x34   : > { %703 = vmatmul.msk.bf16.vlgmr.msra.gmra.mxu1 %vm255_vm2, %v735_v18  ;;  %p849_p4 = scmp.lt.s32.totalorder %s847_s23, %s843_s12 }
  0x35   : > { %705 = vmatmul.msk.bf16.vlgmr.msra.gmra.mxu2 %vm255_vm2, %v735_v18  ;;  %707 = vmatmul.msk.bf16.vlgmr.msra.gmra.mxu3 %vm255_vm2, %v735_v18  ;;  %p845_p13 = pnand %p844_p6, %p975_p11 }
  0x36   : > { %p850_p5 = por %p849_p4, %p848_p3 }
  0x37   : > { %p846_p0 = pneg %p845_p13 }
  0x39   : > { %p851_p7 = pnand %p850_p5, %p846_p0 }
  0x43   : > { %702 = vmatmul.msk.bf16.gmra.mxu0 %vm255_vm2, %v736_v20 }
  0x44   : > { %704 = vmatmul.msk.bf16.gmra.mxu1 %vm255_vm2, %v736_v20 }
  0x45   : > { %706 = vmatmul.msk.bf16.gmra.mxu2 %vm255_vm2, %v736_v20  ;;  %708 = vmatmul.msk.bf16.gmra.mxu3 %vm255_vm2, %v736_v20 }
  0xb0   : > { %v287_v21 = vpop.f32.mrf.mxu0 }
  0xb1   : > { %v306_v22 = vpop.f32.mrf.mxu1  ;;  %v354_v39 = vmax.f32 %v287_v21, 0.0 }
  0xb2   : > { %v355_v42 = vmax.f32 %v306_v22, 0.0 }
  0xb8   : > { %v325_v23 = vpop.f32.mrf.mxu2  ;;  %v344_v24 = vpop.f32.mrf.mxu3 }
  0xb9   : > { %v289_v25 = vpop.f32.mrf.mxu0  ;;  %v308_v26 = vpop.f32.mrf.mxu1  ;;  %v356_v58 = vmax.f32 %v325_v23, 0.0  ;;  %v357_v59 = vmax.f32 %v344_v24, 0.0 }
  0xba   : > { %v358_v40 = vmax.f32 %v289_v25, 0.0  ;;  %v359_v43 = vmax.f32 %v308_v26, 0.0  ;;  %v499_v25 = vld [vmem:[%s1081_s3] sm:$0x1] }
  0xbc   : > { %v370_v46 = vpack.c.bf16 %v358_v40, %v354_v39  ;;  %v371_v50 = vpack.c.bf16 %v359_v43, %v355_v42  ;;  %v899_v40 = vmov 5.0  }
  0xbd   : > { %795 = vrcp.f32 %v899_v40 }
  0xc0   : > { %v327_v27 = vpop.f32.mrf.mxu2  ;;  %v346_v28 = vpop.f32.mrf.mxu3 }
  0xc1   : > { %v292_v29 = vpop.f32.mrf.mxu0  ;;  %v311_v30 = vpop.f32.mrf.mxu1  ;;  %v360_v54 = vmax.f32 %v327_v27, 0.0  ;;  %v361_v56 = vmax.f32 %v346_v28, 0.0 }
  0xc2   : > { %v362_v31 = vmax.f32 %v292_v29, 0.0  ;;  %v363_v33 = vmax.f32 %v311_v30, 0.0 }
  0xc3   : > { %v372_v60 = vpack.c.bf16 %v360_v54, %v356_v58  ;;  %v373_v61 = vpack.c.bf16 %v361_v56, %v357_v59 }
  0xc8   : > { %v330_v32 = vpop.f32.mrf.mxu2  ;;  %v349_v34 = vpop.f32.mrf.mxu3 }
  0xc9   : > { %v294_v35 = vpop.f32.mrf.mxu0  ;;  %v313_v37 = vpop.f32.mrf.mxu1  ;;  %v364_v47 = vmax.f32 %v330_v32, 0.0  ;;  %v365_v52 = vmax.f32 %v349_v34, 0.0 }
  0xca   : > { %v366_v36 = vmax.f32 %v294_v35, 0.0  ;;  %v367_v38 = vmax.f32 %v313_v37, 0.0 }
  0xcc   : > { %v374_v41 = vpack.c.bf16 %v366_v36, %v362_v31  ;;  %v375_v44 = vpack.c.bf16 %v367_v38, %v363_v33 }
  0xce   : > { %405 = vmatpush.bf16.msrb.mxu0 %v374_v41  ;;  %424 = vmatpush.bf16.msrb.mxu1 %v375_v44  ;;  %v796_v41 = vpop.eup %795 }
  0xcf   : > { %v556_v42 = vmul.f32 5.0, %v796_v41  ;;  %vm560_vm4 = vweird.f32 %v796_v41 }
  0xd0   : > { %v332_v45 = vpop.f32.mrf.mxu2  ;;  %v351_v49 = vpop.f32.mrf.mxu3 }
  0xd1   : > { %v368_v48 = vmax.f32 %v332_v45, 0.0  ;;  %v369_v53 = vmax.f32 %v351_v49, 0.0  ;;  %v557_v45 = vsub.f32 1.0, %v556_v42 }
  0xd2   : > { %406 = vmatpush.bf16.msrb.mxu0 %v370_v46  ;;  %425 = vmatpush.bf16.msrb.mxu1 %v371_v50 }
  0xd3   : > { %v376_v55 = vpack.c.bf16 %v368_v48, %v364_v47  ;;  %v377_v57 = vpack.c.bf16 %v369_v53, %v365_v52  ;;  %v558_v46 = vmul.f32 %v796_v41, %v557_v45 }
  0xd5   : > { %443 = vmatpush.bf16.msrb.mxu2 %v376_v55  ;;  %717 = vmatmul.msk.bf16.vlgmr.msrb.gmra.mxu0 %vm392_vm3, %v741_v51  ;;  %v559_v49 = vadd.f32 %v796_v41, %v558_v46 }
  0xd6   : > { %462 = vmatpush.bf16.msrb.mxu3 %v377_v57  ;;  %719 = vmatmul.msk.bf16.vlgmr.msrb.gmra.mxu1 %vm392_vm3, %v741_v51 }
  0xd7   : > { %v561_v50 = vsel %vm560_vm4, %v796_v41, %v559_v49 }
  0xd9   : > { %444 = vmatpush.bf16.msrb.mxu2 %v372_v60 }
  0xda   : > { %463 = vmatpush.bf16.msrb.mxu3 %v373_v61 }
  0xdc   : > { %721 = vmatmul.msk.bf16.vlgmr.msrb.gmra.mxu2 %vm392_vm3, %v741_v51 }
  0xdd   : > { %723 = vmatmul.msk.bf16.vlgmr.msrb.gmra.mxu3 %vm392_vm3, %v741_v51 }
  0xe5   : > { %718 = vmatmul.msk.bf16.gmra.mxu0 %vm392_vm3, %v742_v62 }
  0xe6   : > { %720 = vmatmul.msk.bf16.gmra.mxu1 %vm392_vm3, %v742_v62 }
  0xec   : > { %722 = vmatmul.msk.bf16.gmra.mxu2 %vm392_vm3, %v742_v62 }
  0xed   : > { %724 = vmatmul.msk.bf16.gmra.mxu3 %vm392_vm3, %v742_v62 }
 0x152   : > { %v408_v63 = vpop.f32.mrf.mxu0 }
 0x153   : > { %v427_v0 = vpop.f32.mrf.mxu1  ;;  %v475_v15 = vmax.f32 %v408_v63, 0.0 }
 0x154   : > { %v476_v18 = vmax.f32 %v427_v0, 0.0 }
 0x15a   : > { %v410_v1 = vpop.f32.mrf.mxu0 }
 0x15b   : > { %v429_v2 = vpop.f32.mrf.mxu1  ;;  %v479_v16 = vmax.f32 %v410_v1, 0.0 }
 0x15c   : > { %v480_v19 = vmax.f32 %v429_v2, 0.0 }
 0x15d   : > { %v491_v23 = vpack.c.bf16 %v479_v16, %v475_v15 }
 0x15e   : > { %v492_v24 = vpack.c.bf16 %v480_v19, %v476_v18 }
 0x15f   : > { %v446_v3 = vpop.f32.mrf.mxu2 }
 0x160   : > { %v465_v4 = vpop.f32.mrf.mxu3  ;;  %v477_v36 = vmax.f32 %v446_v3, 0.0 }
 0x161   : > { %v478_v37 = vmax.f32 %v465_v4, 0.0 }
 0x162   : > { %v413_v5 = vpop.f32.mrf.mxu0 }
 0x163   : > { %v432_v6 = vpop.f32.mrf.mxu1  ;;  %v483_v9 = vmax.f32 %v413_v5, 0.0 }
 0x164   : > { %v484_v10 = vmax.f32 %v432_v6, 0.0 }
 0x167   : > { %v448_v7 = vpop.f32.mrf.mxu2 }
 0x168   : > { %v467_v8 = vpop.f32.mrf.mxu3  ;;  %v481_v32 = vmax.f32 %v448_v7, 0.0 }
 0x169   : > { %v482_v34 = vmax.f32 %v467_v8, 0.0 }
 0x16a   : > { %v415_v11 = vpop.f32.mrf.mxu0  ;;  %v493_v38 = vpack.c.bf16 %v481_v32, %v477_v36 }
 0x16b   : > { %v487_v12 = vmax.f32 %v415_v11, 0.0  ;;  %v434_v13 = vpop.f32.mrf.mxu1  ;;  %v494_v39 = vpack.c.bf16 %v482_v34, %v478_v37 }
 0x16c   : > { %v488_v14 = vmax.f32 %v434_v13, 0.0 }
 0x16d   : > { %v495_v17 = vpack.c.bf16 %v487_v12, %v483_v9 }
 0x16e   : > { %v496_v20 = vpack.c.bf16 %v488_v14, %v484_v10 }
 0x16f   : > { %v451_v21 = vpop.f32.mrf.mxu2  ;;  %509 = vmatpush.bf16.msra.mxu0 %v495_v17 }
 0x170   : > { %v470_v22 = vpop.f32.mrf.mxu3  ;;  %522 = vmatpush.bf16.msra.mxu1 %v496_v20  ;;  %v485_v27 = vmax.f32 %v451_v21, 0.0 }
 0x171   : > { %v486_v30 = vmax.f32 %v470_v22, 0.0 }
 0x173   : > { %510 = vmatpush.bf16.msra.mxu0 %v491_v23 }
 0x174   : > { %523 = vmatpush.bf16.msra.mxu1 %v492_v24 }
 0x176   : > { %725 = vmatmul.msk.bf16.vlgmr.msra.gmra.mxu0 %vm392_vm3, %v499_v25 }
 0x177   : > { %v453_v26 = vpop.f32.mrf.mxu2  ;;  %726 = vmatmul.msk.bf16.vlgmr.msra.gmra.mxu1 %vm392_vm3, %v499_v25 }
 0x178   : > { %v489_v28 = vmax.f32 %v453_v26, 0.0  ;;  %v472_v29 = vpop.f32.mrf.mxu3 }
 0x179   : > { %v490_v31 = vmax.f32 %v472_v29, 0.0 }
 0x17a   : > { %v497_v33 = vpack.c.bf16 %v489_v28, %v485_v27 }
 0x17b   : > { %v498_v35 = vpack.c.bf16 %v490_v31, %v486_v30 }
 0x17c   : > { %535 = vmatpush.bf16.msra.mxu2 %v497_v33 }
 0x17d   : > { %548 = vmatpush.bf16.msra.mxu3 %v498_v35 }
 0x180   : > { %536 = vmatpush.bf16.msra.mxu2 %v493_v38 }
 0x181   : > { %549 = vmatpush.bf16.msra.mxu3 %v494_v39 }
 0x183   : > { %727 = vmatmul.msk.bf16.vlgmr.msra.gmra.mxu2 %vm392_vm3, %v499_v25 }
 0x184   : > { %728 = vmatmul.msk.bf16.vlgmr.msra.gmra.mxu3 %vm392_vm3, %v499_v25 }
 0x1f3   : > { %v512_v43 = vpop.f32.mrf.mxu0 }
 0x1f4   : > { %v525_v44 = vpop.f32.mrf.mxu1  ;;  %v562_v55 = vmul.f32 %v561_v50, %v512_v43 }
 0x1f5   : > { %v563_v51 = vmul.f32 %v561_v50, %v525_v44 }
 0x1f7   : > { %v570_v56 = vrot.slane %v563_v51, 6 }
 0x1f9   : > { %v574_v60 = vsel %vm573_vm5, %v562_v55, %v570_v56 }
 0x1fb   : > { %v514_v47 = vpop.f32.mrf.mxu0 }
 0x1fc   : > { %v527_v48 = vpop.f32.mrf.mxu1 }
 0x206   : > { %v538_v52 = vpop.f32.mrf.mxu2 }
 0x207   : > { %v564_v53 = vmul.f32 %v561_v50, %v538_v52  ;;  %v551_v54 = vpop.f32.mrf.mxu3 }
 0x208   : > { %v565_v57 = vmul.f32 %v561_v50, %v551_v54 }
 0x209   : > { %v571_v58 = vrot.slane %v564_v53, 4 }
 0x20a   : > { %v572_v59 = vrot.slane %v565_v57, 2 }
 0x20c   : > { %v576_v61 = vsel %vm575_vm6, %v571_v58, %v572_v59 }
 0x20d   : > { %v578_v62 = vsel %vm577_vm7, %v574_v60, %v576_v61 }
 0x20e   : > { %v540_v63 = vpop.f32.mrf.mxu2  ;;  %580 = vst [vmem:[%s217_s20] sm:$0xff] %v578_v62 }
 0x20f   : > { %v553_v0 = vpop.f32.mrf.mxu3 }
 0x210   : > { %854 = shalt.err (!%p851_p7)
}
 0x211   : > { %746 = dma.vmem_to_hbm [thread:$0]  (%p975_p11), %s596_s26, 128, %s598_s9, %s582_s19  }
 0x212 PF: > { %s609_s8 = sand.u32 1, %s881_s15   ;;  %p753_p8 = pnand %p670_p9, %p979_p12 }
 0x213   : > { %s610_s5 = scalar_lea.sflag [#allocation4], %s609_s8 }
 0x214   : > { %p754_p10 = pneg %p753_p8 }
 0x216   : > { %876 = dma.done.wait (%p754_p10), %s610_s5, 128  }
 0x217   : > { %878 = vsyncadd (%p754_p10), %s610_s5, 4294967168  ;;  %p17_p1 = scmp.ge.s32.totalorder %s950_s21, 4   ;;  %s1088_s15 = smov %s885_s16 }
 0x218   : > { %s1089_s16 = smov %s889_s17  ;;  %s1090_s17 = smov %s962_s24 }
 0x219   : > { %s1091_s18 = smov %s950_s21  ;;  %19 = sbr.rel (!%p17_p1) target bundleno = 5 (0x5), region = 81 }
 0x21e   :  { %616 = vsyncpa [#allocation3], 1 }
 0x21f   :  { %618 = vsyncpa [#allocation3 + $0x1], 1 }
 0x220   :  { %619 = vsyncpa [#allocation4], 1 }
 0x221   :  { %621 = vsyncpa [#allocation4 + $0x1], 1 }

</bundles_post_ra>
